<compile_context>
chip_gen: v5e
topology: v5e:2x2
jax: 0.10.0
libtpu: 0.0.40
codegen_flags: <defaults>
</compile_context>

<pallas_src>
import functools

import jax
import jax.numpy as jnp
from jax.experimental import pallas as pl
from jax.experimental.pallas import tpu as pltpu


def _dot_layer_kernel(x_ref, aux_ref, o_ref, *, D, H):
    # x_ref:   [TB, D]          native dtype (tiny; loaded & cast once)
    # aux_ref: [TB, (D+1)*H]    native dtype, flattened row-major (D+1, H)
    # o_ref:   [TB, H]          out_dtype
    x = x_ref[...].astype(jnp.float32)

    # Bias row: the appended 1 in Y multiplies flat elements D*H:(D+1)*H.
    acc = aux_ref[:, D * H:(D + 1) * H].astype(jnp.float32)

    # Unrolled FMA over the D feature rows. Slice-wise cast keeps the full
    # [TB, A] tile in its native dtype (no f32 copy in VMEM). f32 accumulate is
    # required on v5e (no bf16 VALU) and costs nothing elsewhere.
    # TODO(synk): for large D switch to lax.fori_loop(..., unroll=k) with a
    # grid axis over D (pl.when init/finalize) to bound code size / vregs.
    for d in range(D):
        acc = acc + x[:, d:d + 1] * aux_ref[:, d * H:(d + 1) * H].astype(jnp.float32)

    o_ref[...] = jnp.tanh(acc).astype(o_ref.dtype)


def _round_up(x, m):
    return ((x + m - 1) // m) * m


def dot_layer(X, AUX, *, out_dtype=jnp.float32, target_aux_tile_bytes=6 << 20):
    """Pallas implementation of DotLayer.forward(X, AUX) -> [B, H]."""
    B, D = X.shape
    assert AUX.shape[0] == B, (AUX.shape, X.shape)
    assert AUX.shape[1] % (1 + D) == 0, (
        f"AUX width {AUX.shape[1]} not divisible by 1 + D = {1 + D}"
    )
    A = AUX.shape[1]
    H = A // (1 + D)

    # ---- batch tile size: sized from bytes, never a fixed constant ----------
    row_bytes = A * jnp.dtype(AUX.dtype).itemsize
    if B < 16:
        # Too small to split into >= 2 multiple-of-8 tiles: one whole-array block.
        tb = B
    else:
        # Cap the per-buffer AUX tile at ~target bytes (keeps the double-buffered
        # footprint small on v7x's 64 MiB VMEM) ...
        tb_budget = max(8, (target_aux_tile_bytes // row_bytes) // 8 * 8)
        # ... and force at least 2 grid steps (v7x 2-TC sharding + DMA overlap).
        tb_split = _round_up(pl.cdiv(B, 2), 8)
        tb = int(min(tb_budget, tb_split))

    grid = (pl.cdiv(B, tb),)  # ragged last block: Pallas masks the writeback

    kernel = functools.partial(_dot_layer_kernel, D=D, H=H)

    return pl.pallas_call(
        kernel,
        out_shape=jax.ShapeDtypeStruct((B, H), out_dtype),
        grid=grid,
        in_specs=[
            pl.BlockSpec((tb, D), lambda i: (i, 0)),
            pl.BlockSpec((tb, A), lambda i: (i, 0)),
        ],
        out_specs=pl.BlockSpec((tb, H), lambda i: (i, 0)),
        compiler_params=pltpu.CompilerParams(
            dimension_semantics=("parallel",),
            # 32 MiB is safe on every generation (v7x physical VMEM is 64 MiB
            # per core) and ample for the byte-budgeted, double-buffered tiles.
            vmem_limit_bytes=32 << 20,
        ),
    )(X, AUX)


def dot_layer_ref(X, AUX):
    """Pure-JAX reference mirroring the PyTorch loop (computed in f32)."""
    B, D = X.shape
    H = AUX.shape[1] // (1 + D)
    W = AUX.astype(jnp.float32).reshape(B, D + 1, H)
    Y = jnp.concatenate(
        [X.astype(jnp.float32), jnp.ones((B, 1), jnp.float32)], axis=1
    )  # [B, D+1]
    return jnp.tanh(jnp.einsum("bd,bdh->bh", Y, W))


if __name__ == "__main__":
    key = jax.random.PRNGKey(0)

    # Case 1: shapes matching the module's intent (B=2 samples, D=4, H=32).
    B, D, H = 2, 4, 32
    kx, ka, kx2, ka2 = jax.random.split(key, 4)
    X = jax.random.normal(kx, (B, D), dtype=jnp.float32)
    AUX = jax.random.normal(ka, (B, (1 + D) * H), dtype=jnp.float32)

    out = jax.block_until_ready(dot_layer(X, AUX))
    ref = jax.block_until_ready(dot_layer_ref(X, AUX))
    assert out.shape == (B, H), out.shape
    assert jnp.allclose(out, ref, atol=1e-5, rtol=1e-5), float(
        jnp.max(jnp.abs(out - ref))
    )

    # Case 2: multi-block batch with a ragged last block (no padding path).
    B2 = 20
    X2 = jax.random.normal(kx2, (B2, D), dtype=jnp.float32)
    AUX2 = jax.random.normal(ka2, (B2, (1 + D) * H), dtype=jnp.float32)
    out2 = jax.block_until_ready(dot_layer(X2, AUX2))
    ref2 = jax.block_until_ready(dot_layer_ref(X2, AUX2))
    assert out2.shape == (B2, H), out2.shape
    assert jnp.allclose(out2, ref2, atol=1e-5, rtol=1e-5), float(
        jnp.max(jnp.abs(out2 - ref2))
    )

    print("KERNEL_OK")
</pallas_src>

<mosaic_0001>
module attributes {stable_mosaic.version = 11 : i64} {
  func.func @_dot_layer_kernel(%arg0: i32, %arg1: memref<2x4xf32, #tpu.memory_space<vmem>>, %arg2: memref<2x160xf32, #tpu.memory_space<vmem>>, %arg3: memref<2x32xf32, #tpu.memory_space<vmem>>) attributes {dimension_semantics = [#tpu.dimension_semantics<parallel>], iteration_bounds = array<i64: 1>, scalar_prefetch = 0 : i64, scratch_operands = 0 : i64, tpu.core_type = #tpu.core_type<tc>, window_params = [{transform_indices = @transform_0, window_bounds = array<i64: 2, 4>}, {transform_indices = @transform_1, window_bounds = array<i64: 2, 160>}, {transform_indices = @transform_2, window_bounds = array<i64: 2, 32>}]} {
    %c0 = arith.constant 0 : index
    %c0_0 = arith.constant 0 : index
    %0 = vector.load %arg1[%c0, %c0_0] : memref<2x4xf32, #tpu.memory_space<vmem>>, vector<2x4xf32>
    %c0_1 = arith.constant 0 : index
    %c128 = arith.constant 128 : index
    %1 = vector.load %arg2[%c0_1, %c128] : memref<2x160xf32, #tpu.memory_space<vmem>>, vector<2x32xf32>
    %2 = vector.extract_strided_slice %0 {offsets = [0, 0], sizes = [2, 1], strides = [1, 1]} : vector<2x4xf32> to vector<2x1xf32>
    %c0_2 = arith.constant 0 : index
    %c0_3 = arith.constant 0 : index
    %3 = vector.load %arg2[%c0_2, %c0_3] : memref<2x160xf32, #tpu.memory_space<vmem>>, vector<2x32xf32>
    %4 = vector.broadcast %2 : vector<2x1xf32> to vector<2x32xf32>
    %5 = arith.mulf %4, %3 : vector<2x32xf32>
    %6 = arith.addf %1, %5 : vector<2x32xf32>
    %7 = vector.extract_strided_slice %0 {offsets = [0, 1], sizes = [2, 1], strides = [1, 1]} : vector<2x4xf32> to vector<2x1xf32>
    %c0_4 = arith.constant 0 : index
    %c32 = arith.constant 32 : index
    %8 = vector.load %arg2[%c0_4, %c32] : memref<2x160xf32, #tpu.memory_space<vmem>>, vector<2x32xf32>
    %9 = vector.broadcast %7 : vector<2x1xf32> to vector<2x32xf32>
    %10 = arith.mulf %9, %8 : vector<2x32xf32>
    %11 = arith.addf %6, %10 : vector<2x32xf32>
    %12 = vector.extract_strided_slice %0 {offsets = [0, 2], sizes = [2, 1], strides = [1, 1]} : vector<2x4xf32> to vector<2x1xf32>
    %c0_5 = arith.constant 0 : index
    %c64 = arith.constant 64 : index
    %13 = vector.load %arg2[%c0_5, %c64] : memref<2x160xf32, #tpu.memory_space<vmem>>, vector<2x32xf32>
    %14 = vector.broadcast %12 : vector<2x1xf32> to vector<2x32xf32>
    %15 = arith.mulf %14, %13 : vector<2x32xf32>
    %16 = arith.addf %11, %15 : vector<2x32xf32>
    %17 = vector.extract_strided_slice %0 {offsets = [0, 3], sizes = [2, 1], strides = [1, 1]} : vector<2x4xf32> to vector<2x1xf32>
    %c0_6 = arith.constant 0 : index
    %c96 = arith.constant 96 : index
    %18 = vector.load %arg2[%c0_6, %c96] : memref<2x160xf32, #tpu.memory_space<vmem>>, vector<2x32xf32>
    %19 = vector.broadcast %17 : vector<2x1xf32> to vector<2x32xf32>
    %20 = arith.mulf %19, %18 : vector<2x32xf32>
    %21 = arith.addf %16, %20 : vector<2x32xf32>
    %22 = math.tanh %21 : vector<2x32xf32>
    %c0_7 = arith.constant 0 : index
    %c0_8 = arith.constant 0 : index
    %23 = vector.load %arg3[%c0_7, %c0_8] : memref<2x32xf32, #tpu.memory_space<vmem>>, vector<2x32xf32>
    tpu.vector_store %arg3[%c0_7, %c0_8], %22 {strides = array<i32>} : memref<2x32xf32, #tpu.memory_space<vmem>>, vector<2x32xf32>,
    return
  }
  func.func @transform_0(%arg0: i32) -> (i32, i32) {
    %c0_i32 = arith.constant 0 : i32
    %c0_i32_0 = arith.constant 0 : i32
    return %arg0, %c0_i32 : i32, i32
  }
  func.func @transform_1(%arg0: i32) -> (i32, i32) {
    %c0_i32 = arith.constant 0 : i32
    %c0_i32_0 = arith.constant 0 : i32
    return %arg0, %c0_i32 : i32, i32
  }
  func.func @transform_2(%arg0: i32) -> (i32, i32) {
    %c0_i32 = arith.constant 0 : i32
    %c0_i32_0 = arith.constant 0 : i32
    return %arg0, %c0_i32 : i32, i32
  }
}

</mosaic_0001>

<bundles_post_ra>
// kernel: tpu_custom_call.1
= control target key start
LH: loop header
LB: loop body
LE: loop exit
PB: predicated region body
PF: predicated region fallthrough
CT: control target
= control target key end

     0   :  { %7 = vsyncpa [#allocation3], 0  ;;  %s238_s0 = inlined_call_operand.hbm [shape: f32[2,4], index: 0, kind: input, shape index: {}]   ;;  %s239_s1 = inlined_call_operand.hbm [shape: f32[2,160], index: 1, kind: input, shape index: {}]   ;;  %s240_s2 = inlined_call_operand.hbm [shape: f32[2,32], index: 2, kind: output, shape index: {}]  }
   0x1   :  { %8 = vsyncpa [#allocation6], 0 }
   0x2   :  { %9 = vsyncpa [#allocation4], 0  ;;  %s15_s11 = sshll.u32 %s238_s0, 4  ;;  %s204_s12 = smov [#allocation2]   ;;  %s16_s11 = int_to_ptr.hbm [resolvable:$true] %s15_s11 }
   0x3   :  { %s17_s13 = sshll.u32 %s204_s12, 4  ;;  %s26_s16 = sshll.u32 %s239_s1, 4  ;;  %s18_s13 = int_to_ptr.vmem [resolvable:$true] %s17_s13  ;;  %s27_s16 = int_to_ptr.hbm [resolvable:$true] %s26_s16 }
   0x4   :  { %20 = dma.hbm_to_vmem [thread:$0]  %s16_s11, 32, %s18_s13, [#allocation3]  }
   0x5   :  { %s205_s17 = smov [#allocation5]  }
   0x6   :  { %s28_s18 = sshll.u32 %s205_s17, 4  ;;  %s29_s18 = int_to_ptr.vmem [resolvable:$true] %s28_s18 }
   0x7   :  { %31 = dma.hbm_to_vmem [thread:$0]  %s27_s16, 64, %s29_s18, [#allocation6]  }
   0x8   :  { %198 = dma.done.wait [#allocation3], 32  }
   0x9   :  { %199 = vsyncadd [#allocation3], 4294967264 }
   0xa   :  { %200 = dma.done.wait [#allocation6], 64  }
   0xb   :  { %201 = vsyncadd [#allocation6], 4294967232  ;;  %v206_v0 = vmov 0   ;;  %v207_v1 = vmov 2   ;;  %v208_v2 = vmov 3   ;;  %v209_v7 = vmov 1  }
   0xc   :  { %119 = vset.pattern.permute.xlu0 %v206_v0  ;;  %121 = vset.pattern.permute.xlu1 %v207_v1  ;;  %v40_v3 = vld [vmem:[#allocation2] sm:$0x3]  ;;  %v42_v4 = vld [vmem:[#allocation5] sm:$0x3]  ;;  %s210_s0 = smov 96   ;;  %s211_s1 = smov 64  }
   0xd   :  { %122 = vset.pattern.permute.xlu2 %v208_v2  ;;  %45 = vperm.xlu0 %119, %v40_v3   ;;  %55 = vst [vmem:[#allocation1] ss:$4 sm:$0xff] %v42_v4  ;;  %v62_v5 = vld [vmem:[#allocation5] sm:$0x3]  ;;  %s212_s19 = smov 32   ;;  %s213_s20 = smov [#allocation7]  }
   0xe   :  { %64 = vperm.xlu1 %121, %v40_v3   ;;  %v75_v8 = vld [vmem:[#allocation5] sm:$0x3]  ;;  %v41_v15 = vld [vmem:[#allocation5 + $0x2] sm:$0x3]  ;;  %s96_s21 = sshll.u32 %s213_s20, 4  ;;  %s98_s24 = sshll.u32 %s240_s2, 4  ;;  %s97_s21 = int_to_ptr.vmem [resolvable:$true] %s96_s21  ;;  %s99_s24 = int_to_ptr.hbm [resolvable:$true] %s98_s24 }
   0xf   :  { %vm89_vm0 = vcmask 254976  }
  0x14   :  { %v56_v6 = vld.sshfl [vmem:[#allocation1] sm:$0xff pattern:$0x73625140] }
  0x15   :  { %120 = vset.pattern.permute.xlu0 %v209_v7  ;;  %68 = vst [vmem:[#allocation1] ss:$4 sm:$0xff] %v62_v5 }
  0x16   :  { %57 = vrot.lane.b32.xlu1 %v56_v6, %s210_s0  ;;  %51 = vperm.xlu0 %120, %v40_v3  }
  0x1c   :  { %v69_v9 = vld.sshfl [vmem:[#allocation1] sm:$0xff pattern:$0x73625140] }
  0x1d   :  { %81 = vst [vmem:[#allocation1] ss:$4 sm:$0xff] %v75_v8  ;;  %70 = vrot.lane.b32.xlu2 %v69_v9, %s211_s1 }
  0x1e   :  { %123 = vset.pattern.permute.xlu0 %v208_v2 }
  0x24   :  { %v82_v10 = vld.sshfl [vmem:[#allocation1] sm:$0xff pattern:$0x73625140] }
  0x25   :  { %83 = vrot.lane.b32.xlu1 %v82_v10, %s212_s19  ;;  %77 = vperm.xlu2 %122, %v40_v3  }
  0x77   :  { %v71_v14 = vpop.permute.xlu2 %70 }
  0x7f   :  { %v46_v12 = vpop.permute.xlu0 %45  ;;  %v78_v21 = vpop.permute.xlu2 %77 }
  0x80   :  { %v65_v11 = vpop.permute.xlu1 %64  ;;  %v48_v13 = vmul.f32 %v46_v12, %v42_v4 }
  0x81   :  { %v73_v22 = vmul.f32 %v71_v14, %v65_v11 }
  0x82   :  { %v49_v18 = vadd.f32 %v48_v13, %v41_v15 }
  0x88   :  { %v58_v16 = vpop.permute.xlu1 %57  ;;  %v52_v17 = vpop.permute.xlu0 %51 }
  0x89   :  { %v60_v19 = vmul.f32 %v58_v16, %v52_v17 }
  0x8b   :  { %v61_v20 = vadd.f32 %v60_v19, %v49_v18 }
  0x8d   :  { %v74_v24 = vadd.f32 %v73_v22, %v61_v20 }
  0x97   :  { %v84_v23 = vpop.permute.xlu1 %83 }
  0x98   :  { %v86_v25 = vmul.f32 %v84_v23, %v78_v21 }
  0x9a   :  { %v87_v26 = vadd.f32 %v86_v25, %v74_v24 }
  0x9c   :  { %124 = vtanh.f32 %v87_v26 }
  0xa2   :  { %v125_v27 = vpop.eup %124 }
  0xa3   :  { %90 = vst.msk [vmem:[#allocation7] sm:$0x3] %vm89_vm0, %v125_v27 }
  0xa4   :  { %101 = dma.vmem_to_hbm [thread:$0]  %s97_s21, 32, %s99_s24, [#allocation4]  }
  0xa5   :  { %202 = dma.done.wait [#allocation4], 32  }
  0xa6   :  { %203 = vsyncadd [#allocation4], 4294967264 }
  0xa7   :  { %106 = vsyncpa [#allocation3], 1 }
  0xa8   :  { %107 = vsyncpa [#allocation6], 1 }
  0xa9   :  { %108 = vsyncpa [#allocation4], 1 }

</bundles_post_ra>
